<compile_context>
chip_gen: v5e
topology: v5e:2x2
jax: 0.10.0
libtpu: 0.0.40
codegen_flags: <defaults>
</compile_context>

<pallas_src>
import functools
import math

import jax
import jax.numpy as jnp
from jax import lax
from jax.experimental import pallas as pl
from jax.experimental.pallas import tpu as pltpu


LANES = 128
_ROW_ALIGN = 16          # bf16 sublane tile = 16 rows -> sub-block row alignment
_NO_GRID_MAX_B = 1024    # at/below this batch: un-gridded, fully VMEM-resident


def _round_up(x, m):
    return ((x + m - 1) // m) * m


def _pack_offsets(num_in, num_out, P):
    """Row offsets of the sub-blocks inside the single packed weight array."""
    off_w1a = _round_up(num_in, _ROW_ALIGN)
    off_w2 = off_w1a + _round_up(num_out, _ROW_ALIGN)
    off_w3 = off_w2 + P
    total_rows = _round_up(off_w3 + 2, _ROW_ALIGN)
    return off_w1a, off_w2, off_w3, total_rows


# ----------------------------------------------------------------------------
# Fused Pallas kernel: both Q branches in 3 lane-dense MXU matmuls,
# (2, Bt) output (q1 row / q2 row).
# ----------------------------------------------------------------------------
def _qnetwork_fused_kernel(
    state_ref,    # (Bt, num_in)      f32
    action_ref,   # (Bt, num_out)     f32
    w_ref,        # (rows, P)         bf16 packed weights (see pack_qnetwork_params)
    b_ref,        # (4, P)            f32 biases (rows: l1, l2, b3@lane0, b6@lane0)
    out_ref,      # (2, Bt)           f32, row0 = q1, row1 = q2
    *, num_in, num_out, off_w1a, off_w2, off_w3,
):
    P = w_ref.shape[1]

    # bf16 into the MXU (bf16-native with f32 accumulation on v5e/v6e/v7x);
    # f32 x f32 matmuls would run multi-pass.  Bias/tanh stay in f32.
    s = state_ref[...].astype(jnp.bfloat16)
    a = action_ref[...].astype(jnp.bfloat16)

    w1s = w_ref[0:num_in, :]                     # [W1 || W4], state rows
    w1a = w_ref[off_w1a:off_w1a + num_out, :]    # [W1 || W4], action rows
    w2 = w_ref[off_w2:off_w2 + P, :]             # block-diag(W2, W5)
    w3t = w_ref[off_w3:off_w3 + 2, :]            # row0 = W3^T, row1 = W6^T

    # Layer 1 (both branches): cat(state, action) @ [W1||W4]
    #                        == state @ W1s + action @ W1a.
    h = jnp.dot(s, w1s, preferred_element_type=jnp.float32)
    h = h + jnp.dot(a, w1a, preferred_element_type=jnp.float32)
    h = jnp.tanh(h + b_ref[0:1, :])

    # Layer 2: block-diagonal weight keeps the two branches independent.
    h = jnp.dot(h.astype(jnp.bfloat16), w2, preferred_element_type=jnp.float32)
    h = jnp.tanh(h + b_ref[1:2, :])

    # Layer 3 head: (2, P) x (Bt, P) contracted over P -> (2, Bt), lane-dense.
    q = lax.dot_general(
        w3t, h.astype(jnp.bfloat16),
        dimension_numbers=(((1,), (1,)), ((), ())),
        preferred_element_type=jnp.float32)
    out_ref[...] = jnp.tanh(q + b_ref[2:4, 0:1])


# ----------------------------------------------------------------------------
# Wrapper
# ----------------------------------------------------------------------------
def _choose_block_b(B):
    # >= 2 grid steps (so both v7x TensorCores get work), cap 2048, floor 512,
    # multiple of 256 (keeps DMA lane-dense and per-step overhead amortized).
    half = (B // 2) // 256 * 256
    return int(max(512, min(2048, half)))


def qnetwork_forward(state, action, packed_params):
    """state: (B, num_in), action: (B, num_out). Returns (q1, q2), each (B, 1)."""
    state = state.astype(jnp.float32)
    action = action.astype(jnp.float32)
    wpack, bpack = packed_params

    B, num_in = state.shape
    num_out = action.shape[1]
    P = wpack.shape[1]
    off_w1a, off_w2, off_w3, total_rows = _pack_offsets(num_in, num_out, P)
    assert wpack.shape[0] == total_rows

    kernel = functools.partial(
        _qnetwork_fused_kernel,
        num_in=num_in, num_out=num_out,
        off_w1a=off_w1a, off_w2=off_w2, off_w3=off_w3)

    if B <= _NO_GRID_MAX_B:
        # Small-batch path: no grid, everything resident in VMEM, one shot.
        spec = pl.BlockSpec(memory_space=pltpu.MemorySpace.VMEM)
        out = pl.pallas_call(
            kernel,
            out_shape=jax.ShapeDtypeStruct((2, B), jnp.float32),
            in_specs=[spec, spec, spec, spec],
            out_specs=spec,
        )(state, action, wpack, bpack)
    else:
        # Large-batch path: pad B to a block multiple (any B is supported),
        # shard the batch across the grid / TensorCores.
        block_b = _choose_block_b(B)
        B_pad = _round_up(B, block_b)
        if B_pad != B:
            pad = B_pad - B
            state = jnp.pad(state, ((0, pad), (0, 0)))
            action = jnp.pad(action, ((0, pad), (0, 0)))
        out = pl.pallas_call(
            kernel,
            out_shape=jax.ShapeDtypeStruct((2, B_pad), jnp.float32),
            grid=(B_pad // block_b,),
            in_specs=[
                pl.BlockSpec((block_b, num_in), lambda i: (i, 0)),
                pl.BlockSpec((block_b, num_out), lambda i: (i, 0)),
                pl.BlockSpec(wpack.shape, lambda i: (0, 0)),
                pl.BlockSpec(bpack.shape, lambda i: (0, 0)),
            ],
            out_specs=pl.BlockSpec((2, block_b), lambda i: (0, i)),
            compiler_params=pltpu.CompilerParams(
                dimension_semantics=("parallel",)),
        )(state, action, wpack, bpack)
        out = out[:, :B]

    # Row 0 = q1, row 1 = q2; return module-shaped (B, 1) columns.
    return out[0:1, :].T, out[1:2, :].T


# ----------------------------------------------------------------------------
# Parameter packing: raw per-layer (in, out) params -> one bf16 weight slab +
# one small f32 bias slab.  Done once, outside the hot forward path.
# Zero padding is preserved exactly in bf16, so pad lanes stay inert.
# ----------------------------------------------------------------------------
def pack_qnetwork_params(params, num_in, num_out, hidden_size):
    (w1, b1, w2, b2, w3, b3, w4, b4, w5, b5, w6, b6) = params
    H = hidden_size
    P = _round_up(max(2 * H, 1), LANES)
    off_w1a, off_w2, off_w3, total_rows = _pack_offsets(num_in, num_out, P)

    wp = jnp.zeros((total_rows, P), jnp.float32)
    # Layer 1: [W1 || W4], split into state / action row blocks (16-row aligned).
    wp = wp.at[0:num_in, 0:H].set(w1[:num_in])
    wp = wp.at[0:num_in, H:2 * H].set(w4[:num_in])
    wp = wp.at[off_w1a:off_w1a + num_out, 0:H].set(w1[num_in:])
    wp = wp.at[off_w1a:off_w1a + num_out, H:2 * H].set(w4[num_in:])
    # Layer 2: block-diag(W2, W5), zero elsewhere.
    wp = wp.at[off_w2:off_w2 + H, 0:H].set(w2)
    wp = wp.at[off_w2 + H:off_w2 + 2 * H, H:2 * H].set(w5)
    # Layer 3 head: row 0 = W3^T (lanes [0,H)), row 1 = W6^T (lanes [H,2H)).
    wp = wp.at[off_w3, 0:H].set(w3[:, 0])
    wp = wp.at[off_w3 + 1, H:2 * H].set(w6[:, 0])
    wp = wp.astype(jnp.bfloat16)

    # Biases stay f32: row0=[b1||b4], row1=[b2||b5], row2 lane0=b3, row3 lane0=b6.
    bp = jnp.zeros((4, P), jnp.float32)
    bp = bp.at[0, 0:H].set(b1[0]).at[0, H:2 * H].set(b4[0])
    bp = bp.at[1, 0:H].set(b2[0]).at[1, H:2 * H].set(b5[0])
    bp = bp.at[2, 0].set(b3[0, 0])
    bp = bp.at[3, 0].set(b6[0, 0])
    return wp, bp


# ----------------------------------------------------------------------------
# Deterministic parameter init (mirrors weights_init2: xavier_normal weights,
# zero biases).  Weights stored as (in, out) so y = x @ W + b.
# ----------------------------------------------------------------------------
def _xavier_normal(key, fan_in, fan_out, gain=1.0):
    std = gain * math.sqrt(2.0 / (fan_in + fan_out))
    return std * jax.random.normal(key, (fan_in, fan_out), dtype=jnp.float32)


def init_qnetwork_params(key, num_in, num_out, hidden_size):
    d_in = num_in + num_out
    ks = jax.random.split(key, 6)
    dims = [
        (d_in, hidden_size),          # linear1
        (hidden_size, hidden_size),   # linear2
        (hidden_size, 1),             # linear3
        (d_in, hidden_size),          # linear4
        (hidden_size, hidden_size),   # linear5
        (hidden_size, 1),             # linear6
    ]
    params = []
    for k, (fi, fo) in zip(ks, dims):
        params.append(_xavier_normal(k, fi, fo))
        params.append(jnp.zeros((1, fo), dtype=jnp.float32))
    return tuple(params)


# ----------------------------------------------------------------------------
# Pure-JAX f32 reference (unfused) for correctness checks.
# ----------------------------------------------------------------------------
def qnetwork_ref(state, action, params):
    (w1, b1, w2, b2, w3, b3, w4, b4, w5, b5, w6, b6) = params
    x = jnp.concatenate([state, action], axis=1).astype(jnp.float32)
    h = jnp.tanh(x @ w1 + b1)
    h = jnp.tanh(h @ w2 + b2)
    q1 = jnp.tanh(h @ w3 + b3)
    g = jnp.tanh(x @ w4 + b4)
    g = jnp.tanh(g @ w5 + b5)
    q2 = jnp.tanh(g @ w6 + b6)
    return q1, q2


if __name__ == "__main__":
    # Small shapes consistent with the module's forward:
    #   state: (batch, num_in), action: (batch, num_out)
    batch, num_in, num_out, hidden = 8, 12, 4, 32

    key = jax.random.PRNGKey(0)
    k_state, k_action, k_params, k_bias, k_big = jax.random.split(key, 5)

    state = jax.random.normal(k_state, (batch, num_in), dtype=jnp.float32)
    action = jax.random.normal(k_action, (batch, num_out), dtype=jnp.float32)

    raw_params = init_qnetwork_params(k_params, num_in, num_out, hidden)
    packed = pack_qnetwork_params(raw_params, num_in, num_out, hidden)

    q1, q2 = qnetwork_forward(state, action, packed)
    jax.block_until_ready((q1, q2))

    r1, r2 = qnetwork_ref(state, action, raw_params)
    assert q1.shape == (batch, 1) and q2.shape == (batch, 1)
    # Kernel uses bf16 weights/activations on the MXU -> relaxed tolerance vs f32 ref.
    assert jnp.allclose(q1, r1, atol=2e-2), "q1 mismatch vs reference"
    assert jnp.allclose(q2, r2, atol=2e-2), "q2 mismatch vs reference"

    # Non-zero biases (module init zeroes them, but forward semantics include them).
    bias_keys = jax.random.split(k_bias, 6)
    rp = list(raw_params)
    for j, bk in enumerate(bias_keys):
        fo = rp[2 * j + 1].shape[1]
        rp[2 * j + 1] = 0.1 * jax.random.normal(bk, (1, fo), dtype=jnp.float32)
    rp = tuple(rp)
    packed_b = pack_qnetwork_params(rp, num_in, num_out, hidden)
    qb1, qb2 = qnetwork_forward(state, action, packed_b)
    rb1, rb2 = qnetwork_ref(state, action, rp)
    assert jnp.allclose(qb1, rb1, atol=2e-2), "q1 mismatch (nonzero biases)"
    assert jnp.allclose(qb2, rb2, atol=2e-2), "q2 mismatch (nonzero biases)"

    # Gridded large-batch path: non-divisible B exercises padding + >=2 grid steps.
    big_b = 3000
    kb_s, kb_a = jax.random.split(k_big)
    big_state = jax.random.normal(kb_s, (big_b, num_in), dtype=jnp.float32)
    big_action = jax.random.normal(kb_a, (big_b, num_out), dtype=jnp.float32)
    g1, g2 = qnetwork_forward(big_state, big_action, packed)
    jax.block_until_ready((g1, g2))
    gr1, gr2 = qnetwork_ref(big_state, big_action, raw_params)
    assert g1.shape == (big_b, 1) and g2.shape == (big_b, 1)
    assert jnp.allclose(g1, gr1, atol=2e-2), "q1 mismatch (gridded path)"
    assert jnp.allclose(g2, gr2, atol=2e-2), "q2 mismatch (gridded path)"

    print("KERNEL_OK")
</pallas_src>

<mosaic_0001>
module attributes {stable_mosaic.version = 11 : i64} {
  func.func @_qnetwork_fused_kernel(%arg0: memref<8x12xf32, #tpu.memory_space<vmem>>, %arg1: memref<8x4xf32, #tpu.memory_space<vmem>>, %arg2: memref<176x128xbf16, #tpu.memory_space<vmem>>, %arg3: memref<4x128xf32, #tpu.memory_space<vmem>>, %arg4: memref<2x8xf32, #tpu.memory_space<vmem>>) attributes {dimension_semantics = [], scalar_prefetch = 0 : i64, scratch_operands = 0 : i64, tpu.core_type = #tpu.core_type<tc>} {
    %c0 = arith.constant 0 : index
    %c0_0 = arith.constant 0 : index
    %0 = vector.load %arg0[%c0, %c0_0] : memref<8x12xf32, #tpu.memory_space<vmem>>, vector<8x12xf32>
    %1 = arith.truncf %0 : vector<8x12xf32> to vector<8x12xbf16>
    %c0_1 = arith.constant 0 : index
    %c0_2 = arith.constant 0 : index
    %2 = vector.load %arg1[%c0_1, %c0_2] : memref<8x4xf32, #tpu.memory_space<vmem>>, vector<8x4xf32>
    %3 = arith.truncf %2 : vector<8x4xf32> to vector<8x4xbf16>
    %c0_3 = arith.constant 0 : index
    %c0_4 = arith.constant 0 : index
    %4 = vector.load %arg2[%c0_3, %c0_4] : memref<176x128xbf16, #tpu.memory_space<vmem>>, vector<12x128xbf16>
    %c16 = arith.constant 16 : index
    %c0_5 = arith.constant 0 : index
    %5 = vector.load %arg2[%c16, %c0_5] : memref<176x128xbf16, #tpu.memory_space<vmem>>, vector<4x128xbf16>
    %c32 = arith.constant 32 : index
    %c0_6 = arith.constant 0 : index
    %6 = vector.load %arg2[%c32, %c0_6] : memref<176x128xbf16, #tpu.memory_space<vmem>>, vector<128x128xbf16>
    %c160 = arith.constant 160 : index
    %c0_7 = arith.constant 0 : index
    %7 = vector.load %arg2[%c160, %c0_7] : memref<176x128xbf16, #tpu.memory_space<vmem>>, vector<2x128xbf16>
    %cst = arith.constant dense<0.000000e+00> : vector<8x128xf32>
    %8 = tpu.matmul %1, %4, %cst {dimension_numbers = #tpu.dot_dimension_numbers<[1], [0], [0], [1], [0, 0, 1, 1], [], []>} : vector<8x12xbf16>, vector<12x128xbf16>, vector<8x128xf32> -> vector<8x128xf32>
    %cst_8 = arith.constant dense<0.000000e+00> : vector<8x128xf32>
    %9 = tpu.matmul %3, %5, %cst_8 {dimension_numbers = #tpu.dot_dimension_numbers<[1], [0], [0], [1], [0, 0, 1, 1], [], []>} : vector<8x4xbf16>, vector<4x128xbf16>, vector<8x128xf32> -> vector<8x128xf32>
    %10 = arith.addf %8, %9 : vector<8x128xf32>
    %c0_9 = arith.constant 0 : index
    %c0_10 = arith.constant 0 : index
    %11 = vector.load %arg3[%c0_9, %c0_10] : memref<4x128xf32, #tpu.memory_space<vmem>>, vector<1x128xf32>
    %12 = vector.broadcast %11 : vector<1x128xf32> to vector<8x128xf32>
    %13 = arith.addf %10, %12 : vector<8x128xf32>
    %14 = math.tanh %13 : vector<8x128xf32>
    %15 = arith.truncf %14 : vector<8x128xf32> to vector<8x128xbf16>
    %cst_11 = arith.constant dense<0.000000e+00> : vector<8x128xf32>
    %16 = tpu.matmul %15, %6, %cst_11 {dimension_numbers = #tpu.dot_dimension_numbers<[1], [0], [0], [1], [0, 0, 1, 1], [], []>} : vector<8x128xbf16>, vector<128x128xbf16>, vector<8x128xf32> -> vector<8x128xf32>
    %c1 = arith.constant 1 : index
    %c0_12 = arith.constant 0 : index
    %17 = vector.load %arg3[%c1, %c0_12] : memref<4x128xf32, #tpu.memory_space<vmem>>, vector<1x128xf32>
    %18 = vector.broadcast %17 : vector<1x128xf32> to vector<8x128xf32>
    %19 = arith.addf %16, %18 : vector<8x128xf32>
    %20 = math.tanh %19 : vector<8x128xf32>
    %21 = arith.truncf %20 : vector<8x128xf32> to vector<8x128xbf16>
    %cst_13 = arith.constant dense<0.000000e+00> : vector<2x8xf32>
    %22 = tpu.matmul %7, %21, %cst_13 {dimension_numbers = #tpu.dot_dimension_numbers<[1], [1], [0], [0], [0, 0, 1, 0], [], []>} : vector<2x128xbf16>, vector<8x128xbf16>, vector<2x8xf32> -> vector<2x8xf32>
    %c2 = arith.constant 2 : index
    %c0_14 = arith.constant 0 : index
    %23 = vector.load %arg3[%c2, %c0_14] : memref<4x128xf32, #tpu.memory_space<vmem>>, vector<2x1xf32>
    %24 = vector.broadcast %23 : vector<2x1xf32> to vector<2x8xf32>
    %25 = arith.addf %22, %24 : vector<2x8xf32>
    %26 = math.tanh %25 : vector<2x8xf32>
    %c0_15 = arith.constant 0 : index
    %c0_16 = arith.constant 0 : index
    %27 = vector.load %arg4[%c0_15, %c0_16] : memref<2x8xf32, #tpu.memory_space<vmem>>, vector<2x8xf32>
    tpu.vector_store %arg4[%c0_15, %c0_16], %26 {strides = array<i32>} : memref<2x8xf32, #tpu.memory_space<vmem>>, vector<2x8xf32>,
    return
  }
}

</mosaic_0001>

<bundles_post_ra>
// kernel: tpu_custom_call.1
= control target key start
LH: loop header
LB: loop body
LE: loop exit
PB: predicated region body
PF: predicated region fallthrough
CT: control target
= control target key end

     0   :  { %9 = vsyncpa [#allocation3], 0  ;;  %s379_s0 = inlined_call_operand.vmem [shape: f32[8,12], index: 0, kind: input, shape index: {}]   ;;  %s380_s1 = inlined_call_operand.vmem [shape: f32[8,4], index: 1, kind: input, shape index: {}]   ;;  %s381_s2 = inlined_call_operand.hbm [shape: bf16[176,128], index: 2, kind: input, shape index: {}]   ;;  %s382_s3 = inlined_call_operand.vmem [shape: f32[4,128], index: 3, kind: input, shape index: {}]   ;;  %s383_s4 = inlined_call_operand.hbm [shape: f32[2,8], index: 4, kind: output, shape index: {}]  }
   0x1   :  { %10 = vsyncpa [#allocation4], 0  ;;  %s19_s17 = sshll.u32 %s381_s2, 4  ;;  %s328_s18 = smov [#allocation2]   ;;  %s20_s17 = int_to_ptr.hbm [resolvable:$true] %s19_s17 }
   0x2   :  { %s21_s19 = sshll.u32 %s328_s18, 4  ;;  %s329_s20 = smov 64   ;;  %s22_s19 = int_to_ptr.vmem [resolvable:$true] %s21_s19 }
   0x3   :  { %s330_s21 = smov 4  }
   0x4   :  { %27 = dma.hbm_to_vmem [thread:$0]  %s20_s17, 1408, %s22_s19, [#allocation3], %s329_s20, %s329_s20, %s330_s21  }
   0x5   :  { %324 = dma.done.wait [#allocation3], 1408  }
   0x6   :  { %325 = vsyncadd [#allocation3], 4294965888  ;;  %vm63_vm0 = vcmask 1041408   ;;  %vm89_vm1 = vcmask 1045504   ;;  %v41_v0 = vld [vmem:[#allocation2 + $0x8] sm:$0x3] }
   0x7   :  { %v218_v1 = vld [vmem:[#allocation2] sm:$0xf]  ;;  %v253_v2 = vld [vmem:[#allocation2] sm:$0x30]  ;;  %v65_v3 = vsel %vm63_vm0, %v41_v0, 0  ;;  %v261_v7 = vld [vmem:[#allocation2 + $0x48] sm:$0xff] }
   0x8   :  { %v219_v4 = vor.u32 %v253_v2, %v218_v1  ;;  %v37_v5 = vld [vmem:[%s380_s1] sm:$0xff]  ;;  %74 = vmatpush.bf16.msra.mxu0 %v65_v3  ;;  %vm59_vm2 = vcmask 31744   ;;  %161 = vmatpush.bf16.msra.mxu2 %v261_v7  ;;  %vm85_vm3 = vcmask 97280   ;;  %v259_v12 = vld [vmem:[#allocation2 + $0x38] sm:$0xff]  ;;  %v258_v13 = vld [vmem:[#allocation2 + $0x30] sm:$0xff]  ;;  %v331_v28 = vmov 0  }
   0x9   :  { %v35_v6 = vld [vmem:[%s379_s0] sm:$0xff]  ;;  %v38_v8 = vpack.c.bf16 %v37_v5, %v37_v5  ;;  %v257_v14 = vld [vmem:[#allocation2 + $0x28] sm:$0xff]  ;;  %v255_v16 = vld [vmem:[#allocation2 + $0x18] sm:$0xff]  ;;  %267 = vset.pattern.permute.xlu0 %v331_v28  ;;  %s332_s29 = smov [#allocation5]   ;;  %s205_s7 = sshll.u32 %s383_s4, 4  ;;  %vm196_vm4 = vcmask 58368   ;;  %s206_s7 = int_to_ptr.hbm [resolvable:$true] %s205_s7 }
   0xa   :  { %v91_v9 = vsel %vm89_vm1, %v219_v4, 0  ;;  %v36_v10 = vpack.c.bf16 %v35_v6, %v35_v6  ;;  %v260_v11 = vld [vmem:[#allocation2 + $0x40] sm:$0xff]  ;;  %v254_v17 = vld [vmem:[#allocation2 + $0x10] sm:$0xff]  ;;  %s203_s30 = sshll.u32 %s332_s29, 4  ;;  %s204_s30 = int_to_ptr.vmem [resolvable:$true] %s203_s30 }
   0xb   :  { %100 = vmatpush.bf16.msra.mxu1 %v91_v9  ;;  %215 = vmatmul.msk.bf16.vlgmr.msra.gmra.mxu0 %vm59_vm2, %v38_v8  ;;  %v256_v15 = vld [vmem:[#allocation2 + $0x20] sm:$0xff]  ;;  %v58_v35 = vld [vmem:[#allocation2 + $0x50] sm:$0x1] }
   0xc   :  { %162 = vmatpush.bf16.msra.mxu2 %v260_v11  ;;  %v268_v19 = vld [vmem:[%s382_s3] ss:$0 sm:$0xff]  ;;  %v176_v27 = vld [vmem:[%s382_s3 + $0x2] sm:$0x3]  ;;  %v269_v29 = vld [vmem:[%s382_s3 + $0x1] ss:$0 sm:$0xff] }
   0xd   :  { %179 = vperm.xlu0 %267, %v176_v27  }
   0xe   :  { %220 = vmatmul.msk.bf16.vlgmr.msra.gmra.mxu1 %vm85_vm3, %v36_v10 }
  0x10   :  { %163 = vmatpush.bf16.msra.mxu2 %v259_v12 }
  0x14   :  { %164 = vmatpush.bf16.msra.mxu2 %v258_v13 }
  0x18   :  { %165 = vmatpush.bf16.msra.mxu2 %v257_v14 }
  0x1c   :  { %166 = vmatpush.bf16.msra.mxu2 %v256_v15 }
  0x20   :  { %167 = vmatpush.bf16.msra.mxu2 %v255_v16 }
  0x24   :  { %168 = vmatpush.bf16.msra.mxu2 %v254_v17 }
  0x7f   :  { %v180_v36 = vpop.permute.xlu0 %179 }
  0x88   :  { %v76_v18 = vpop.f32.mrf.mxu0 }
  0x8b   :  { %v102_v20 = vpop.f32.mrf.mxu1 }
  0x8c   :  { %v103_v21 = vadd.f32 %v102_v20, %v76_v18 }
  0x8e   :  { %v108_v22 = vadd.f32 %v268_v19, %v103_v21 }
  0x90   :  { %270 = vtanh.f32 %v108_v22  ;;  %v78_v23 = vpop.f32.mrf.mxu0 }
  0x93   :  { %v104_v24 = vpop.f32.mrf.mxu1 }
  0x96   :  { %v271_v25 = vpop.eup %270 }
  0x97   :  { %v110_v26 = vpack.c.bf16 %v271_v25, %v271_v25 }
  0x99   :  { %169 = vmatmul.bf16.vlgmr.msra.gmra.mxu2 %v110_v26 }
 0x11c   :  { %v170_v30 = vpop.f32.mrf.mxu2 }
 0x11d   :  { %v171_v31 = vadd.f32 %v269_v29, %v170_v30 }
 0x11f   :  { %272 = vtanh.f32 %v171_v31 }
 0x124   :  { %v172_v32 = vpop.f32.mrf.mxu2 }
 0x125   :  { %v273_v33 = vpop.eup %272 }
 0x126   :  { %v175_v34 = vpack.c.bf16 %v273_v33, %v273_v33 }
 0x128   :  { %189 = vmatpush.bf16.xpose.msra.mxu3 %v175_v34 }
 0x12f   :  { %190 = vmatmul.bf16.vlgmr.msra.gmra.mxu3 %v58_v35 }
 0x1b2   :  { %v191_v37 = vpop.f32.mrf.mxu3 }
 0x1b3   :  { %v192_v38 = vadd.f32 %v191_v37, %v180_v36 }
 0x1b5   :  { %274 = vtanh.f32 %v192_v38 }
 0x1ba   :  { %v193_v39 = vpop.f32.mrf.mxu3 }
 0x1bb   :  { %v275_v40 = vpop.eup %274 }
 0x1bc   :  { %197 = vst.msk [vmem:[#allocation5] sm:$0x3] %vm196_vm4, %v275_v40 }
 0x1bd   :  { %208 = dma.vmem_to_hbm [thread:$0]  %s204_s30, 32, %s206_s7, [#allocation4]  }
 0x1be   :  { %326 = dma.done.wait [#allocation4], 32  }
 0x1bf   :  { %327 = vsyncadd [#allocation4], 4294967264 }
 0x1c0   :  { %213 = vsyncpa [#allocation3], 1 }
 0x1c1   :  { %214 = vsyncpa [#allocation4], 1 }

</bundles_post_ra>
